<compile_context>
chip_gen: v5e
topology: v5e:2x2
jax: 0.10.0
libtpu: 0.0.40
codegen_flags: <defaults>
</compile_context>

<pallas_src>
import jax
import jax.numpy as jnp
from jax.experimental import pallas as pl
from jax.experimental.pallas import tpu as pltpu


_SMALL_BYTES = 2 << 20          # <= 2 MiB: untiled single-shot fast path
_TARGET_BLOCK_BYTES = 2 << 20   # ~2 MiB per input block (x2 specs x2 buffers ~ 8 MiB VMEM)
_LANE_WIDTH = 1024              # wide multiple of 128 -> unmasked, lane-dense stores


def _scale_kernel(a_ref, b_ref, o_ref):
    # b_ref is a (1, 1) scalar in SMEM; broadcast-multiply on the VPU.
    o_ref[...] = a_ref[...] * b_ref[0, 0]


def _scale_untiled(a, b_smem):
    """Whole-array-in-VMEM path for tiny inputs (no grid, no pipeline overhead)."""
    return pl.pallas_call(
        _scale_kernel,
        out_shape=jax.ShapeDtypeStruct(a.shape, a.dtype),
        in_specs=[
            pl.BlockSpec(memory_space=pltpu.MemorySpace.VMEM),  # a
            pl.BlockSpec(memory_space=pltpu.MemorySpace.SMEM),  # b scalar
        ],
        out_specs=pl.BlockSpec(memory_space=pltpu.MemorySpace.VMEM),
    )(a, b_smem)


def _pick_block_dim(dim, target, align):
    """Largest block extent <= target that is either the full dim or align-multiple."""
    if dim <= target:
        return dim                       # full extent is always a legal block dim
    return max(align, (target // align) * align)


def _scale_gridded(a2, b_smem):
    """Gridded, double-buffered path for a 2-D array (blocks ~2 MiB, lane-aligned)."""
    m, n = a2.shape
    itemsize = a2.dtype.itemsize
    bn = _pick_block_dim(n, _LANE_WIDTH, 128)
    bm_target = max(8, _TARGET_BLOCK_BYTES // (bn * itemsize))
    bm = _pick_block_dim(m, bm_target, 8)
    grid = (pl.cdiv(m, bm), pl.cdiv(n, bn))
    return pl.pallas_call(
        _scale_kernel,
        out_shape=jax.ShapeDtypeStruct(a2.shape, a2.dtype),
        grid=grid,
        in_specs=[
            pl.BlockSpec((bm, bn), lambda i, j: (i, j)),         # a tile
            pl.BlockSpec(memory_space=pltpu.MemorySpace.SMEM),   # b scalar (whole, SMEM)
        ],
        out_specs=pl.BlockSpec((bm, bn), lambda i, j: (i, j)),
        compiler_params=pltpu.CompilerParams(
            # Independent tiles: shard the grid across v7x's two TensorCores.
            dimension_semantics=("parallel", "parallel"),
        ),
        cost_estimate=pl.CostEstimate(
            flops=a2.size,
            transcendentals=0,
            bytes_accessed=2 * a2.size * itemsize + itemsize,
        ),
    )(a2, b_smem)


def squeeze_broadcast(a: jax.Array, b: jax.Array) -> jax.Array:
    """Pallas implementation of SqueezeBroadcastModule.forward(a, b) = a * b.squeeze()."""
    # torch's .squeeze() on a 0-d tensor is an identity; we only need the scalar.
    b_smem = jnp.reshape(b, (1, 1)).astype(a.dtype)
    nbytes = a.size * a.dtype.itemsize

    if nbytes <= _SMALL_BYTES:
        # Tiny input: pipeline overhead would dominate; single-shot path.
        return _scale_untiled(a, b_smem)

    if a.size % _LANE_WIDTH == 0:
        # a*scalar is reshape-invariant: present a lane-dense (rows, 1024) slab
        # so every output store is a full, unmasked vst regardless of N.
        a2 = a.reshape(a.size // _LANE_WIDTH, _LANE_WIDTH)
        return _scale_gridded(a2, b_smem).reshape(a.shape)

    # Fallback: tile the original 2-D shape directly (128-aligned column block,
    # ragged edge blocks handled by Pallas).
    return _scale_gridded(a, b_smem)


if __name__ == "__main__":
    key = jax.random.PRNGKey(0)
    ka, kb, kc, kd = jax.random.split(key, 4)

    # b: 0-d float32 scalar tensor (matches the [] annotation).
    b = jax.random.normal(kb, (), dtype=jnp.float32)

    # Small 2-D input consistent with the [-1, -1] contract: untiled fast path.
    a_small = jax.random.normal(ka, (16, 256), dtype=jnp.float32)
    out_small = jax.block_until_ready(squeeze_broadcast(a_small, b))
    ref_small = a_small * b
    assert out_small.shape == ref_small.shape, (out_small.shape, ref_small.shape)
    assert out_small.dtype == ref_small.dtype, (out_small.dtype, ref_small.dtype)
    assert bool(jnp.allclose(out_small, ref_small, rtol=0.0, atol=0.0)), "small-path mismatch"

    # Moderately larger input whose element count divides 1024: gridded,
    # lane-dense reshape path (ragged row-edge block).
    a_mid = jax.random.normal(kc, (640, 1664), dtype=jnp.float32)
    out_mid = jax.block_until_ready(squeeze_broadcast(a_mid, b))
    assert bool(jnp.allclose(out_mid, a_mid * b, rtol=0.0, atol=0.0)), "gridded-path mismatch"

    # Element count NOT a multiple of 1024: direct 2-D tiling path with ragged
    # edge blocks on both axes.
    a_odd = jax.random.normal(kd, (520, 1032), dtype=jnp.float32)
    out_odd = jax.block_until_ready(squeeze_broadcast(a_odd, b))
    assert bool(jnp.allclose(out_odd, a_odd * b, rtol=0.0, atol=0.0)), "fallback-path mismatch"

    print("KERNEL_OK")
</pallas_src>

<mosaic_0001>
module attributes {stable_mosaic.version = 11 : i64} {
  func.func @_scale_kernel(%arg0: memref<16x256xf32, #tpu.memory_space<vmem>>, %arg1: memref<1x1xf32, #tpu.memory_space<smem>>, %arg2: memref<16x256xf32, #tpu.memory_space<vmem>>) attributes {dimension_semantics = [], scalar_prefetch = 0 : i64, scratch_operands = 0 : i64, tpu.core_type = #tpu.core_type<tc>} {
    %c0 = arith.constant 0 : index
    %c0_0 = arith.constant 0 : index
    %0 = vector.load %arg0[%c0, %c0_0] : memref<16x256xf32, #tpu.memory_space<vmem>>, vector<16x256xf32>
    %c0_1 = arith.constant 0 : index
    %c0_2 = arith.constant 0 : index
    %1 = memref.load %arg1[%c0_1, %c0_2] : memref<1x1xf32, #tpu.memory_space<smem>>
    %2 = vector.broadcast %1 : f32 to vector<16x256xf32>
    %3 = arith.mulf %0, %2 : vector<16x256xf32>
    %c0_3 = arith.constant 0 : index
    %c0_4 = arith.constant 0 : index
    %4 = vector.load %arg2[%c0_3, %c0_4] : memref<16x256xf32, #tpu.memory_space<vmem>>, vector<16x256xf32>
    tpu.vector_store %arg2[%c0_3, %c0_4], %3 {strides = array<i32>} : memref<16x256xf32, #tpu.memory_space<vmem>>, vector<16x256xf32>,
    return
  }
}

</mosaic_0001>

<bundles_post_ra>
// kernel: tpu_custom_call.1
= control target key start
LH: loop header
LB: loop body
LE: loop exit
PB: predicated region body
PF: predicated region fallthrough
CT: control target
= control target key end

     0   :  { %8 = vsyncpa [#allocation4], 0  ;;  %s146_s0 = inlined_call_operand.hbm [shape: f32[16,256], index: 0, kind: input, shape index: {}]   ;;  %s147_s1 = inlined_call_operand.<no memory space> [shape: f32[1,1], index: 1, kind: input, shape index: {}]   ;;  %s148_s2 = inlined_call_operand.hbm [shape: f32[16,256], index: 2, kind: output, shape index: {}]  }
   0x1   :  { %9 = vsyncpa [#allocation5], 0  ;;  %s14_s11 = sshll.u32 %s146_s0, 4  ;;  %s118_s12 = smov [#allocation3]   ;;  %s15_s11 = int_to_ptr.hbm [resolvable:$true] %s14_s11 }
   0x2   :  { %s16_s13 = sshll.u32 %s118_s12, 4  ;;  %s119_s14 = smov 256   ;;  %s17_s13 = int_to_ptr.vmem [resolvable:$true] %s16_s13 }
   0x3   :  { %s120_s15 = smov 16  }
   0x4   :  { %22 = dma.hbm_to_vmem [thread:$0]  %s15_s11, 512, %s17_s13, [#allocation4], %s119_s14, %s119_s14, %s120_s15  }
   0x5   :  { %114 = dma.done.wait [#allocation4], 512  }
   0x6   :  { %115 = vsyncadd [#allocation4], 4294966784  ;;  %v34_v0 = vstv %s147_s1  ;;  %v29_v1 = vld [vmem:[#allocation3] sm:$0xff]  ;;  %v30_v2 = vld [vmem:[#allocation3 + $0x8] sm:$0xff]  ;;  %s121_s0 = smov [#allocation6]   ;;  %s49_s21 = sshll.u32 %s148_s2, 4  ;;  %s50_s21 = int_to_ptr.hbm [resolvable:$true] %s49_s21 }
   0x7   :  { %v31_v3 = vld [vmem:[#allocation3 + $0x10] sm:$0xff]  ;;  %v35_v4 = vmul.f32 %v34_v0, %v29_v1  ;;  %v36_v5 = vmul.f32 %v34_v0, %v30_v2  ;;  %v32_v7 = vld [vmem:[#allocation3 + $0x18] sm:$0xff]  ;;  %s47_s18 = sshll.u32 %s121_s0, 4  ;;  %s48_s18 = int_to_ptr.vmem [resolvable:$true] %s47_s18 }
   0x8   :  { %v37_v6 = vmul.f32 %v34_v0, %v31_v3  ;;  %v38_v8 = vmul.f32 %v34_v0, %v32_v7 }
   0x9   :  { %39 = vst [vmem:[#allocation6] sm:$0xff] %v35_v4 }
   0xa   :  { %40 = vst [vmem:[#allocation6 + $0x8] sm:$0xff] %v36_v5 }
   0xb   :  { %41 = vst [vmem:[#allocation6 + $0x10] sm:$0xff] %v37_v6 }
   0xc   :  { %42 = vst [vmem:[#allocation6 + $0x18] sm:$0xff] %v38_v8 }
   0xd   :  { %55 = dma.vmem_to_hbm [thread:$0]  %s48_s18, 512, %s50_s21, [#allocation5], %s119_s14, %s119_s14, %s120_s15  }
   0xe   :  { %116 = dma.done.wait [#allocation5], 512  }
   0xf   :  { %117 = vsyncadd [#allocation5], 4294966784 }
  0x10   :  { %60 = vsyncpa [#allocation4], 1 }
  0x11   :  { %61 = vsyncpa [#allocation5], 1 }

</bundles_post_ra>
